<compile_context>
chip_gen: v6e
topology: v6e:2x2x1
jax: 0.10.0
libtpu: 0.0.40
codegen_flags: <defaults>
</compile_context>

<pallas_src>
import jax
import jax.numpy as jnp
from jax.experimental import pallas as pl
from jax.experimental.pallas import tpu as pltpu


def _make_fm_kernel(num_fields: int, embed_dim: int):
    F, D = num_fields, embed_dim

    def fm_kernel(x_ref, o_ref):
        # x_ref: (batch_tile, F*D) lane-dense tile in VMEM; o_ref: (batch_tile, 1)
        x = x_ref[...].astype(jnp.float32)

        # sum over fields at each embed dim: (bt, D)
        t = x[:, 0:D]
        for f in range(1, F):
            t = t + x[:, f * D:(f + 1) * D]

        # 0.5 * ( sum_d (sum_f x)^2  -  sum_{f,d} x^2 )
        square_of_sum = jnp.sum(t * t, axis=-1, keepdims=True)        # (bt, 1)
        sum_of_square = jnp.sum(x * x, axis=-1, keepdims=True)        # (bt, 1)
        o_ref[...] = (0.5 * (square_of_sum - sum_of_square)).astype(o_ref.dtype)

    return fm_kernel


def fm_forward(x, batch_tile=None):
    """FM pairwise interaction, reduce_sum=True.  x: (B, F, D) -> (B, 1)."""
    B, F, D = x.shape
    FD = F * D
    itemsize = jnp.dtype(x.dtype).itemsize

    # Lane-dense input: (B, F, D) is contiguous, so this reshape is free.
    x2 = x.reshape(B, FD)

    # Target ~2 MiB of input per grid step (mem-bound kernel); cap so tiny
    # batches do not over-pad; keep the tile a multiple of 8 sublanes.
    if batch_tile is None:
        batch_tile = max(8, min(4096, (2 * 1024 * 1024) // (FD * itemsize)))
    b_ceil8 = ((B + 7) // 8) * 8
    batch_tile = min(batch_tile, b_ceil8)
    batch_tile = max(8, (batch_tile // 8) * 8)

    # Pad batch to a multiple of batch_tile (zero rows give zero output; sliced off).
    Bp = ((B + batch_tile - 1) // batch_tile) * batch_tile
    if Bp != B:
        x2 = jnp.pad(x2, ((0, Bp - B), (0, 0)))

    grid = (Bp // batch_tile,)

    out = pl.pallas_call(
        _make_fm_kernel(F, D),
        out_shape=jax.ShapeDtypeStruct((Bp, 1), x.dtype),
        grid_spec=pltpu.PrefetchScalarGridSpec(
            num_scalar_prefetch=0,
            grid=grid,
            in_specs=[
                # lane-dense (batch_tile, F*D) tile; last dim equals the full array dim
                pl.BlockSpec((batch_tile, FD), lambda b: (b, 0)),
            ],
            out_specs=pl.BlockSpec((batch_tile, 1), lambda b: (b, 0)),
        ),
        compiler_params=pltpu.CompilerParams(
            dimension_semantics=("parallel",),
            vmem_limit_bytes=32 * 1024 * 1024,
        ),
    )(x2)
    return out[:B]


def fm_reference(x):
    s = jnp.sum(x, axis=1) ** 2
    sq = jnp.sum(x * x, axis=1)
    return 0.5 * jnp.sum(s - sq, axis=1, keepdims=True)


if __name__ == "__main__":
    key = jax.random.PRNGKey(0)

    # Case 1: F*D = 128 lanes, divisible batch.
    B, F, D = 16, 4, 32
    x = jax.random.normal(key, (B, F, D), dtype=jnp.float32)
    out = jax.block_until_ready(fm_forward(x))
    ref = fm_reference(x)
    assert out.shape == (B, 1), out.shape
    assert jnp.allclose(out, ref, atol=1e-4, rtol=1e-4), (
        f"mismatch: max err {jnp.max(jnp.abs(out - ref))}"
    )

    # Case 2: non-divisible batch (exercises the padded tail), different F/D split.
    B2, F2, D2 = 13, 2, 64
    x_b = jax.random.normal(jax.random.PRNGKey(1), (B2, F2, D2), dtype=jnp.float32)
    out2 = jax.block_until_ready(fm_forward(x_b))
    ref2 = fm_reference(x_b)
    assert out2.shape == (B2, 1), out2.shape
    assert jnp.allclose(out2, ref2, atol=1e-4, rtol=1e-4), (
        f"mismatch: max err {jnp.max(jnp.abs(out2 - ref2))}"
    )

    print("KERNEL_OK")
</pallas_src>

<mosaic_0001>
module attributes {stable_mosaic.version = 11 : i64} {
  func.func @fm_kernel(%arg0: i32, %arg1: memref<16x128xf32, #tpu.memory_space<vmem>>, %arg2: memref<16x1xf32, #tpu.memory_space<vmem>>) attributes {dimension_semantics = [#tpu.dimension_semantics<parallel>], iteration_bounds = array<i64: 1>, scalar_prefetch = 0 : i64, scratch_operands = 0 : i64, tpu.core_type = #tpu.core_type<tc>, window_params = [{transform_indices = @transform_0, window_bounds = array<i64: 16, 128>}, {transform_indices = @transform_1, window_bounds = array<i64: 16, 1>}]} {
    %c0 = arith.constant 0 : index
    %c0_0 = arith.constant 0 : index
    %0 = vector.load %arg1[%c0, %c0_0] : memref<16x128xf32, #tpu.memory_space<vmem>>, vector<16x128xf32>
    %1 = vector.extract_strided_slice %0 {offsets = [0, 0], sizes = [16, 32], strides = [1, 1]} : vector<16x128xf32> to vector<16x32xf32>
    %2 = vector.extract_strided_slice %0 {offsets = [0, 32], sizes = [16, 32], strides = [1, 1]} : vector<16x128xf32> to vector<16x32xf32>
    %3 = arith.addf %1, %2 : vector<16x32xf32>
    %4 = vector.extract_strided_slice %0 {offsets = [0, 64], sizes = [16, 32], strides = [1, 1]} : vector<16x128xf32> to vector<16x32xf32>
    %5 = arith.addf %3, %4 : vector<16x32xf32>
    %6 = vector.extract_strided_slice %0 {offsets = [0, 96], sizes = [16, 32], strides = [1, 1]} : vector<16x128xf32> to vector<16x32xf32>
    %7 = arith.addf %5, %6 : vector<16x32xf32>
    %8 = arith.mulf %7, %7 : vector<16x32xf32>
    %cst = arith.constant dense<0.000000e+00> : vector<16xf32>
    %9 = vector.multi_reduction <add>, %8, %cst [1] : vector<16x32xf32> to vector<16xf32>
    %10 = vector.shape_cast %9 : vector<16xf32> to vector<16x1xf32>
    %11 = arith.mulf %0, %0 : vector<16x128xf32>
    %cst_1 = arith.constant dense<0.000000e+00> : vector<16xf32>
    %12 = vector.multi_reduction <add>, %11, %cst_1 [1] : vector<16x128xf32> to vector<16xf32>
    %13 = vector.shape_cast %12 : vector<16xf32> to vector<16x1xf32>
    %14 = arith.subf %10, %13 : vector<16x1xf32>
    %cst_2 = arith.constant 5.000000e-01 : f32
    %15 = vector.broadcast %cst_2 : f32 to vector<16x1xf32>
    %16 = arith.mulf %15, %14 : vector<16x1xf32>
    %c0_3 = arith.constant 0 : index
    %c0_4 = arith.constant 0 : index
    %17 = vector.load %arg2[%c0_3, %c0_4] : memref<16x1xf32, #tpu.memory_space<vmem>>, vector<16x1xf32>
    tpu.vector_store %arg2[%c0_3, %c0_4], %16 {strides = array<i32>} : memref<16x1xf32, #tpu.memory_space<vmem>>, vector<16x1xf32>,
    return
  }
  func.func @transform_0(%arg0: i32) -> (i32, i32) {
    %c0_i32 = arith.constant 0 : i32
    %c0_i32_0 = arith.constant 0 : i32
    return %arg0, %c0_i32 : i32, i32
  }
  func.func @transform_1(%arg0: i32) -> (i32, i32) {
    %c0_i32 = arith.constant 0 : i32
    %c0_i32_0 = arith.constant 0 : i32
    return %arg0, %c0_i32 : i32, i32
  }
}

</mosaic_0001>

<bundles_post_ra>
// kernel: tpu_custom_call.1
= control target key start
LH: loop header
LB: loop body
LE: loop exit
PB: predicated region body
PF: predicated region fallthrough
CT: control target
= control target key end

     0   :  { %6 = vsyncpa [#allocation3], 0  ;;  %s105_s6 = smov [#allocation2]   ;;  %s130_s0 = inlined_call_operand.hbm [shape: f32[16,128], index: 0, kind: input, shape index: {}]   ;;  %s131_s1 = inlined_call_operand.vmem [shape: f32[16,1], index: 1, kind: output, shape index: {}]  }
   0x1   :  { %s12_s7 = sshll.u32 %s105_s6, 4  ;;  %s13_s7 = int_to_ptr.vmem [resolvable:$true] %s12_s7 }
   0x2   :  { %s91_s8 = scalar_lea.vmem %s13_s7, 256  ;;  %p96_p1 = scmp.lt.s32.totalorder %s13_s7, %s13_s7 }
   0x3   :  { %p92_p0 = scmp.ne.s32.totalorder %s13_s7, %s91_s8  ;;  %p97_p2 = scmp.lt.s32.totalorder %s91_s8, %s91_s8 }
   0x5   :  { %p98_p3 = por %p97_p2, %p96_p1 }
   0x7   :  { %p99_p4 = pnand %p98_p3, %p92_p0 }
   0x9   :  { %102 = shalt.err (!%p99_p4)
}
   0xa   :  { %s106_s9 = smov 128   ;;  %s107_s10 = smov 8  }
   0xb   :  { %18 = dma.hbm_to_vmem [thread:$0]  %s130_s0, 256, %s13_s7, [#allocation3], %s106_s9, %s106_s9, %s107_s10  }
   0xc   :  { %103 = dma.done.wait [#allocation3], 256  }
   0xd   :  { %104 = vsyncadd [#allocation3], 4294967040  ;;  %v22_v0 = vld [vmem:[#allocation2] sm:$0xff]  ;;  %s108_s13 = smov 64   ;;  %s109_s14 = smov 96   ;;  %v23_v1 = vld [vmem:[#allocation2 + $0x8] sm:$0xff] }
   0xe   :  { %34 = vrot.lane.b32.xlu1 %v22_v0, %s108_s13  ;;  %26 = vrot.lane.b32.xlu0 %v22_v0, %s109_s14  ;;  %s110_s15 = smov 32   ;;  %vm52_vm0 = vcmask 261120   ;;  %v59_v18 = vmul.f32 %v22_v0, %v22_v0  ;;  %v60_v19 = vmul.f32 %v23_v1, %v23_v1  ;;  %vm69_vm1 = vcmask 7168  }
  0x12   :  { %36 = vrot.lane.b32.xlu1 %v23_v1, %s108_s13  ;;  %28 = vrot.lane.b32.xlu0 %v23_v1, %s109_s14 }
  0x16   :  { %44 = vrot.lane.b32.xlu1 %v23_v1, %s110_s15  ;;  %42 = vrot.lane.b32.xlu0 %v22_v0, %s110_s15 }
  0x80   :  { %v35_v2 = vpop.permute.xlu1 %34  ;;  %v27_v3 = vpop.permute.xlu0 %26 }
  0x81   :  { %v32_v4 = vadd.f32 %v27_v3, %v22_v0 }
  0x83   :  { %v40_v9 = vadd.f32 %v35_v2, %v32_v4 }
  0x84   :  { %v37_v5 = vpop.permute.xlu1 %36  ;;  %v29_v6 = vpop.permute.xlu0 %28 }
  0x85   :  { %v33_v7 = vadd.f32 %v29_v6, %v23_v1 }
  0x87   :  { %v41_v8 = vadd.f32 %v37_v5, %v33_v7 }
  0x88   :  { %v45_v10 = vpop.permute.xlu1 %44  ;;  %v43_v11 = vpop.permute.xlu0 %42 }
  0x89   :  { %v49_v12 = vadd.f32 %v45_v10, %v41_v8  ;;  %v48_v13 = vadd.f32 %v43_v11, %v40_v9 }
  0x8b   :  { %v51_v14 = vmul.f32 %v49_v12, %v49_v12  ;;  %v50_v15 = vmul.f32 %v48_v13, %v48_v13 }
  0x8d   :  { %v56_v16 = vsel %vm52_vm0, %v51_v14, 0.0  ;;  %v53_v17 = vsel %vm52_vm0, %v50_v15, 0.0 }
  0x8e   :  { %57 = vadd.xlane.f32.xlu1 %v56_v16  ;;  %54 = vadd.xlane.f32.xlu0 %v53_v17 }
  0x92   :  { %61 = vadd.xlane.f32.xlu0 %v59_v18 }
  0x96   :  { %63 = vadd.xlane.f32.xlu0 %v60_v19 }
 0x117   :  { %v55_v20 = vpop.xlane.xlu0 %54  ;;  %v58_v24 = vpop.xlane.xlu1 %57 }
 0x11b   :  { %v62_v21 = vpop.xlane.xlu0 %61 }
 0x11c   :  { %v65_v22 = vsub.f32 %v55_v20, %v62_v21 }
 0x11e   :  { %v67_v23 = vmul.f32 0.5, %v65_v22 }
 0x11f   :  { %v64_v25 = vpop.xlane.xlu0 %63 }
 0x120   :  { %70 = vst.msk [vmem:[%s131_s1] sm:$0xff] %vm69_vm1, %v67_v23  ;;  %v66_v26 = vsub.f32 %v58_v24, %v64_v25 }
 0x122   :  { %v68_v27 = vmul.f32 0.5, %v66_v26 }
 0x124   :  { %71 = vst.msk [vmem:[%s131_s1 + $0x8] sm:$0xff] %vm69_vm1, %v68_v27 }
 0x125   :  { %76 = vsyncpa [#allocation3], 1 }

</bundles_post_ra>
